<compile_context>
chip_gen: v7x
topology: tpu7x:2x2x1
jax: 0.10.0
libtpu: 0.0.40
codegen_flags: <defaults>
</compile_context>

<pallas_src>
import functools

import jax
import jax.numpy as jnp
from jax.experimental import pallas as pl
from jax.experimental.pallas import tpu as pltpu


def _round_up(x, m):
    return ((x + m - 1) // m) * m


def _choose_seq_tile(s_eff, batch, target):
    """Pick a multiple-of-8 divisor of s_eff as the sequence tile size."""
    divs = [d for d in range(8, s_eff + 1, 8) if s_eff % d == 0]
    if not divs:
        return s_eff
    fitting = [d for d in divs if d <= target] or [divs[0]]
    # Prefer tiles that give the grid >= 4 parallel steps (keeps both v7x
    # TensorCores busy); among those prefer >= 256-row tiles (~1 MiB DMAs).
    good = [d for d in fitting if batch * (s_eff // d) >= 4]
    if good:
        big = [d for d in good if d >= 256]
        return max(big) if big else max(good)
    return max(fitting)


def _emb_ln_kernel(we_ref, pe_ref, tt_ref, type_tab_ref, gamma_ref, beta_ref,
                   o_ref, *, eps, n_types):
    # we_ref:       (1, TS, H)  gathered word embeddings for this (seq-tile, batch)
    # pe_ref:       (TS, H)     position-embedding rows (re-DMA skipped across batch)
    # tt_ref:       (1, TS, 1)  int32 token-type ids for this tile
    # type_tab_ref: (T, H)      full token-type table (tiny, resident)
    we = we_ref[0].astype(jnp.float32)                        # (TS, H)
    pe = pe_ref[...].astype(jnp.float32)                      # (TS, H)
    tt = tt_ref[0]                                            # (TS, 1) int32

    if n_types == 2:
        # Single broadcast FMA instead of compare/select loop.
        row0 = type_tab_ref[0:1, :].astype(jnp.float32)       # (1, H)
        row1 = type_tab_ref[1:2, :].astype(jnp.float32)       # (1, H)
        te = row0 + tt.astype(jnp.float32) * (row1 - row0)    # (TS, H)
    else:
        te = jnp.zeros_like(we)
        for t in range(n_types):                              # static unroll
            row = type_tab_ref[t:t + 1, :].astype(jnp.float32)
            te = jnp.where(tt == t, row, te)

    x = we + pe + te                                          # (TS, H) f32

    # One-pass LayerNorm moments: var = E[x^2] - mean^2 (biased, as torch).
    inv_h = 1.0 / x.shape[-1]
    s1 = jnp.sum(x, axis=-1, keepdims=True)
    s2 = jnp.sum(x * x, axis=-1, keepdims=True)
    mean = s1 * inv_h
    var = jnp.maximum(s2 * inv_h - mean * mean, 0.0)
    inv = jax.lax.rsqrt(var + eps)

    # gamma/beta stay (1, H) and broadcast implicitly — no extra (TS, H) temps.
    y = (x - mean) * inv * gamma_ref[...] + beta_ref[...]
    o_ref[0, :, :] = y.astype(o_ref.dtype)


def bert_embeddings(input_ids, token_type_ids, params, *, eps=1e-12,
                    seq_tile=512, out_dtype=jnp.float32):
    """input_ids, token_type_ids: int32 (B, S). Returns (B, S, H) in out_dtype.

    seq_tile: target rows per grid step. 512 is safe for v7x's 64 MiB VMEM;
    v5e/v6e (128 MiB VMEM) can pass 1024 for slightly fewer grid steps.
    """
    B, S = input_ids.shape
    word_tab = params["word_emb"]
    pos_tab = params["pos_emb"]
    type_tab = params["type_emb"]
    H = word_tab.shape[1]
    n_types = type_tab.shape[0]
    P = pos_tab.shape[0]

    if S > P:
        raise ValueError(
            f"sequence length {S} exceeds max_position_embeddings {P}")

    # --- choose the sequence tiling (avoid padding / post-kernel slice) ---
    if S % 8 == 0:
        S_pad = S
        ts = _choose_seq_tile(S, B, seq_tile)
    elif S <= 2048:
        # Whole-sequence block: block dim == array dim, so the (8,128)
        # divisibility rule does not apply. No pad, no slice.
        S_pad = S
        ts = S
    else:
        # Rare: very long ragged sequence. Pad only to a multiple of 8.
        S_pad = _round_up(S, 8)
        ts = _choose_seq_tile(S_pad, B, seq_tile)

    needs_pad = S_pad != S
    if needs_pad:
        pad = ((0, 0), (0, S_pad - S))
        input_ids = jnp.pad(input_ids, pad)          # pad token id 0
        token_type_ids = jnp.pad(token_type_ids, pad)

    # --- glue: only the word-embedding gather stays in XLA (vocab-sized).
    # With bf16 tables the gathered intermediate is bf16 -> half the HBM I/O.
    we = jnp.take(word_tab, input_ids, axis=0)        # (B, S_pad, H)

    if S_pad <= P:
        pos = pos_tab[:S_pad]                          # (S_pad, H)
    else:  # only reachable on the pad path; extra rows are sliced off below
        pos = jnp.concatenate(
            [pos_tab, jnp.zeros((S_pad - P, H), pos_tab.dtype)], axis=0)

    tt3 = token_type_ids.astype(jnp.int32)[..., None]  # (B, S_pad, 1)
    gamma = params["ln_gamma"].astype(jnp.float32).reshape(1, H)
    beta = params["ln_beta"].astype(jnp.float32).reshape(1, H)

    kernel = functools.partial(_emb_ln_kernel, eps=eps, n_types=n_types)

    num_seq_tiles = S_pad // ts
    grid = (num_seq_tiles, B)   # seq-tile major, batch minor

    in_specs = [
        pl.BlockSpec((1, ts, H), lambda s, b: (b, s, 0)),      # word emb rows
        pl.BlockSpec((ts, H), lambda s, b: (s, 0)),            # pos rows (const over b)
        pl.BlockSpec((1, ts, 1), lambda s, b: (b, s, 0)),      # token-type ids
        pl.BlockSpec((n_types, H), lambda s, b: (0, 0)),       # type table (resident)
        pl.BlockSpec((1, H), lambda s, b: (0, 0)),             # gamma (resident)
        pl.BlockSpec((1, H), lambda s, b: (0, 0)),             # beta  (resident)
    ]
    out_spec = pl.BlockSpec((1, ts, H), lambda s, b: (b, s, 0))

    # VMEM estimate: double-buffered streams (we, pe, out, ids) plus the
    # in-kernel f32 temporaries (~3 tiles) plus resident small tables.
    we_b = jnp.dtype(we.dtype).itemsize
    pe_b = jnp.dtype(pos.dtype).itemsize
    out_b = jnp.dtype(out_dtype).itemsize
    est = (2 * (ts * H * (we_b + pe_b + out_b) + ts * 4)
           + 3 * ts * H * 4
           + n_types * H * 4 + 2 * H * 4
           + (2 << 20))
    # Floor at 32 MiB (covers the small v5e default scoped limit), cap at
    # 48 MiB so the request stays inside v7x's 64 MiB physical VMEM.
    vmem_limit = int(min(max(est, 32 * 1024 * 1024), 48 * 1024 * 1024))

    out = pl.pallas_call(
        kernel,
        out_shape=jax.ShapeDtypeStruct((B, S_pad, H), out_dtype),
        grid_spec=pltpu.PrefetchScalarGridSpec(
            num_scalar_prefetch=0,
            grid=grid,
            in_specs=in_specs,
            out_specs=out_spec,
        ),
        compiler_params=pltpu.CompilerParams(
            dimension_semantics=("parallel", "parallel"),
            vmem_limit_bytes=vmem_limit,
        ),
    )(we, pos, tt3, type_tab, gamma, beta)

    if needs_pad:
        out = out[:, :S, :]
    return out


def init_params(key, vocab_size, hidden_size, max_position_embeddings,
                type_vocab_size, initializer_range=0.02,
                table_dtype=jnp.bfloat16):
    """Embedding tables stored in bf16 by default (halves HBM traffic of the
    mem-bound kernel); all in-kernel math is f32. LN params stay f32."""
    k1, k2, k3 = jax.random.split(key, 3)
    word_emb = initializer_range * jax.random.normal(
        k1, (vocab_size, hidden_size), jnp.float32)
    # padding_idx=0 -> row 0 is zeros (matches nn.Embedding(padding_idx=0))
    word_emb = word_emb.at[0].set(0.0)
    pos_emb = initializer_range * jax.random.normal(
        k2, (max_position_embeddings, hidden_size), jnp.float32)
    type_emb = initializer_range * jax.random.normal(
        k3, (type_vocab_size, hidden_size), jnp.float32)
    return {
        "word_emb": word_emb.astype(table_dtype),
        "pos_emb": pos_emb.astype(table_dtype),
        "type_emb": type_emb.astype(table_dtype),
        "ln_gamma": jnp.ones((hidden_size,), jnp.float32),
        "ln_beta": jnp.zeros((hidden_size,), jnp.float32),
    }


def _reference(input_ids, token_type_ids, params, eps=1e-12):
    """Pure-JAX reference: same tables (upcast to f32), two-pass LayerNorm."""
    B, S = input_ids.shape
    pos_ids = jnp.broadcast_to(jnp.arange(S, dtype=jnp.int32)[None, :], (B, S))
    x = (params["word_emb"].astype(jnp.float32)[input_ids]
         + params["pos_emb"].astype(jnp.float32)[pos_ids]
         + params["type_emb"].astype(jnp.float32)[token_type_ids])
    mean = jnp.mean(x, axis=-1, keepdims=True)
    var = jnp.mean((x - mean) ** 2, axis=-1, keepdims=True)
    return ((x - mean) * jax.lax.rsqrt(var + eps) * params["ln_gamma"]
            + params["ln_beta"])


if __name__ == "__main__":
    # Small synthetic BertConfig: vocab=1000, hidden=128, max_pos=64, types=2
    VOCAB, HIDDEN, MAX_POS, TYPES = 1000, 128, 64, 2
    B, S = 2, 32

    key = jax.random.PRNGKey(0)
    kp, ki, kt = jax.random.split(key, 3)
    params = init_params(kp, VOCAB, HIDDEN, MAX_POS, TYPES)

    input_ids = jax.random.randint(ki, (B, S), 0, VOCAB, dtype=jnp.int32)
    token_type_ids = jax.random.randint(kt, (B, S), 0, TYPES, dtype=jnp.int32)

    out = jax.block_until_ready(bert_embeddings(input_ids, token_type_ids, params))
    ref = _reference(input_ids, token_type_ids, params)
    assert out.shape == (B, S, HIDDEN)
    assert jnp.allclose(out, ref, atol=2e-5, rtol=2e-5), "mismatch vs reference"

    # Ragged sequence length (not a multiple of 8) exercises the
    # whole-sequence-block path (no padding, no post-kernel slice).
    S2 = 20
    ki2, kt2 = jax.random.split(jax.random.PRNGKey(1))
    input_ids2 = jax.random.randint(ki2, (B, S2), 0, VOCAB, dtype=jnp.int32)
    token_type_ids2 = jax.random.randint(kt2, (B, S2), 0, TYPES, dtype=jnp.int32)
    out2 = jax.block_until_ready(
        bert_embeddings(input_ids2, token_type_ids2, params))
    ref2 = _reference(input_ids2, token_type_ids2, params)
    assert out2.shape == (B, S2, HIDDEN)
    assert jnp.allclose(out2, ref2, atol=2e-5, rtol=2e-5), "mismatch (ragged)"

    print("KERNEL_OK")
</pallas_src>

<mosaic_0001>
module attributes {stable_mosaic.version = 11 : i64} {
  func.func @_emb_ln_kernel(%arg0: i32, %arg1: i32, %arg2: memref<1x16x128xbf16, #tpu.memory_space<vmem>>, %arg3: memref<16x128xbf16, #tpu.memory_space<vmem>>, %arg4: memref<1x16x1xi32, #tpu.memory_space<vmem>>, %arg5: memref<2x128xbf16, #tpu.memory_space<vmem>>, %arg6: memref<1x128xf32, #tpu.memory_space<vmem>>, %arg7: memref<1x128xf32, #tpu.memory_space<vmem>>, %arg8: memref<1x16x128xf32, #tpu.memory_space<vmem>>) attributes {dimension_semantics = [#tpu.dimension_semantics<parallel>, #tpu.dimension_semantics<parallel>], iteration_bounds = array<i64: 2, 2>, scalar_prefetch = 0 : i64, scratch_operands = 0 : i64, tpu.core_type = #tpu.core_type<tc>, window_params = [{transform_indices = @transform_0, window_bounds = array<i64: 1, 16, 128>}, {transform_indices = @transform_1, window_bounds = array<i64: 16, 128>}, {transform_indices = @transform_2, window_bounds = array<i64: 1, 16, 1>}, {pipeline_mode = #tpu.pipeline_mode<synchronous>, transform_indices = @transform_3, window_bounds = array<i64: 2, 128>}, {pipeline_mode = #tpu.pipeline_mode<synchronous>, transform_indices = @transform_4, window_bounds = array<i64: 1, 128>}, {pipeline_mode = #tpu.pipeline_mode<synchronous>, transform_indices = @transform_5, window_bounds = array<i64: 1, 128>}, {transform_indices = @transform_6, window_bounds = array<i64: 1, 16, 128>}]} {
    %c0 = arith.constant 0 : index
    %c0_0 = arith.constant 0 : index
    %c0_1 = arith.constant 0 : index
    %0 = vector.load %arg2[%c0, %c0_0, %c0_1] : memref<1x16x128xbf16, #tpu.memory_space<vmem>>, vector<1x16x128xbf16>
    %1 = vector.shape_cast %0 : vector<1x16x128xbf16> to vector<16x128xbf16>
    %2 = arith.extf %1 : vector<16x128xbf16> to vector<16x128xf32>
    %c0_2 = arith.constant 0 : index
    %c0_3 = arith.constant 0 : index
    %3 = vector.load %arg3[%c0_2, %c0_3] : memref<16x128xbf16, #tpu.memory_space<vmem>>, vector<16x128xbf16>
    %4 = arith.extf %3 : vector<16x128xbf16> to vector<16x128xf32>
    %c0_4 = arith.constant 0 : index
    %c0_5 = arith.constant 0 : index
    %c0_6 = arith.constant 0 : index
    %5 = vector.load %arg4[%c0_4, %c0_5, %c0_6] : memref<1x16x1xi32, #tpu.memory_space<vmem>>, vector<1x16x1xi32>
    %6 = vector.shape_cast %5 : vector<1x16x1xi32> to vector<16x1xi32>
    %c0_7 = arith.constant 0 : index
    %c0_8 = arith.constant 0 : index
    %7 = vector.load %arg5[%c0_7, %c0_8] : memref<2x128xbf16, #tpu.memory_space<vmem>>, vector<1x128xbf16>
    %8 = arith.extf %7 : vector<1x128xbf16> to vector<1x128xf32>
    %c1 = arith.constant 1 : index
    %c0_9 = arith.constant 0 : index
    %9 = vector.load %arg5[%c1, %c0_9] : memref<2x128xbf16, #tpu.memory_space<vmem>>, vector<1x128xbf16>
    %10 = arith.extf %9 : vector<1x128xbf16> to vector<1x128xf32>
    %11 = arith.sitofp %6 : vector<16x1xi32> to vector<16x1xf32>
    %12 = arith.subf %10, %8 : vector<1x128xf32>
    %13 = vector.broadcast %11 : vector<16x1xf32> to vector<16x128xf32>
    %14 = vector.broadcast %12 : vector<1x128xf32> to vector<16x128xf32>
    %15 = arith.mulf %13, %14 : vector<16x128xf32>
    %16 = vector.broadcast %8 : vector<1x128xf32> to vector<16x128xf32>
    %17 = arith.addf %16, %15 : vector<16x128xf32>
    %18 = arith.addf %2, %4 : vector<16x128xf32>
    %19 = arith.addf %18, %17 : vector<16x128xf32>
    %cst = arith.constant dense<0.000000e+00> : vector<16xf32>
    %20 = vector.multi_reduction <add>, %19, %cst [1] : vector<16x128xf32> to vector<16xf32>
    %21 = vector.shape_cast %20 : vector<16xf32> to vector<16x1xf32>
    %22 = arith.mulf %19, %19 : vector<16x128xf32>
    %cst_10 = arith.constant dense<0.000000e+00> : vector<16xf32>
    %23 = vector.multi_reduction <add>, %22, %cst_10 [1] : vector<16x128xf32> to vector<16xf32>
    %24 = vector.shape_cast %23 : vector<16xf32> to vector<16x1xf32>
    %cst_11 = arith.constant 7.812500e-03 : f32
    %25 = vector.broadcast %cst_11 : f32 to vector<16x1xf32>
    %26 = arith.mulf %21, %25 : vector<16x1xf32>
    %cst_12 = arith.constant 7.812500e-03 : f32
    %27 = vector.broadcast %cst_12 : f32 to vector<16x1xf32>
    %28 = arith.mulf %24, %27 : vector<16x1xf32>
    %29 = arith.mulf %26, %26 : vector<16x1xf32>
    %30 = arith.subf %28, %29 : vector<16x1xf32>
    %cst_13 = arith.constant 0.000000e+00 : f32
    %31 = vector.broadcast %cst_13 : f32 to vector<16x1xf32>
    %32 = arith.maximumf %30, %31 : vector<16x1xf32>
    %cst_14 = arith.constant 9.99999996E-13 : f32
    %33 = vector.broadcast %cst_14 : f32 to vector<16x1xf32>
    %34 = arith.addf %32, %33 : vector<16x1xf32>
    %35 = math.rsqrt %34 : vector<16x1xf32>
    %36 = vector.broadcast %26 : vector<16x1xf32> to vector<16x128xf32>
    %37 = arith.subf %19, %36 : vector<16x128xf32>
    %38 = vector.broadcast %35 : vector<16x1xf32> to vector<16x128xf32>
    %39 = arith.mulf %37, %38 : vector<16x128xf32>
    %c0_15 = arith.constant 0 : index
    %c0_16 = arith.constant 0 : index
    %40 = vector.load %arg6[%c0_15, %c0_16] : memref<1x128xf32, #tpu.memory_space<vmem>>, vector<1x128xf32>
    %41 = vector.broadcast %40 : vector<1x128xf32> to vector<16x128xf32>
    %42 = arith.mulf %39, %41 : vector<16x128xf32>
    %c0_17 = arith.constant 0 : index
    %c0_18 = arith.constant 0 : index
    %43 = vector.load %arg7[%c0_17, %c0_18] : memref<1x128xf32, #tpu.memory_space<vmem>>, vector<1x128xf32>
    %44 = vector.broadcast %43 : vector<1x128xf32> to vector<16x128xf32>
    %45 = arith.addf %42, %44 : vector<16x128xf32>
    %c0_19 = arith.constant 0 : index
    %c0_20 = arith.constant 0 : index
    %c0_21 = arith.constant 0 : index
    %46 = vector.load %arg8[%c0_19, %c0_20, %c0_21] : memref<1x16x128xf32, #tpu.memory_space<vmem>>, vector<1x16x128xf32>
    %47 = vector.shape_cast %46 : vector<1x16x128xf32> to vector<16x128xf32>
    %48 = vector.shape_cast %45 : vector<16x128xf32> to vector<1x16x128xf32>
    tpu.vector_store %arg8[%c0_19, %c0_20, %c0_21], %48 {strides = array<i32>} : memref<1x16x128xf32, #tpu.memory_space<vmem>>, vector<1x16x128xf32>,
    return
  }
  func.func @transform_0(%arg0: i32, %arg1: i32) -> (i32, i32, i32) {
    %c0_i32 = arith.constant 0 : i32
    %c0_i32_0 = arith.constant 0 : i32
    return %arg1, %arg0, %c0_i32 : i32, i32, i32
  }
  func.func @transform_1(%arg0: i32, %arg1: i32) -> (i32, i32) {
    %c0_i32 = arith.constant 0 : i32
    %c0_i32_0 = arith.constant 0 : i32
    return %arg0, %c0_i32 : i32, i32
  }
  func.func @transform_2(%arg0: i32, %arg1: i32) -> (i32, i32, i32) {
    %c0_i32 = arith.constant 0 : i32
    %c0_i32_0 = arith.constant 0 : i32
    return %arg1, %arg0, %c0_i32 : i32, i32, i32
  }
  func.func @transform_3(%arg0: i32, %arg1: i32) -> (i32, i32) {
    %c0_i32 = arith.constant 0 : i32
    %c0_i32_0 = arith.constant 0 : i32
    %c0_i32_1 = arith.constant 0 : i32
    return %c0_i32, %c0_i32_0 : i32, i32
  }
  func.func @transform_4(%arg0: i32, %arg1: i32) -> (i32, i32) {
    %c0_i32 = arith.constant 0 : i32
    %c0_i32_0 = arith.constant 0 : i32
    %c0_i32_1 = arith.constant 0 : i32
    return %c0_i32, %c0_i32_0 : i32, i32
  }
  func.func @transform_5(%arg0: i32, %arg1: i32) -> (i32, i32) {
    %c0_i32 = arith.constant 0 : i32
    %c0_i32_0 = arith.constant 0 : i32
    %c0_i32_1 = arith.constant 0 : i32
    return %c0_i32, %c0_i32_0 : i32, i32
  }
  func.func @transform_6(%arg0: i32, %arg1: i32) -> (i32, i32, i32) {
    %c0_i32 = arith.constant 0 : i32
    %c0_i32_0 = arith.constant 0 : i32
    return %arg1, %arg0, %c0_i32 : i32, i32, i32
  }
}

</mosaic_0001>

<bundles_post_ra>
// kernel: tpu_custom_call.1
= control target key start
LH: loop header
LB: loop body
LE: loop exit
PB: predicated region body
PF: predicated region fallthrough
CT: control target
= control target key end

     0   :  { %11 = vsyncpa [#allocation3], 0  ;;  %s958_s0 = inlined_call_operand.vmem [shape: bf16[2,32,128], index: 0, kind: input, shape index: {}]   ;;  %s959_s1 = inlined_call_operand.vmem [shape: bf16[32,128], index: 1, kind: input, shape index: {}]   ;;  %s960_s2 = inlined_call_operand.vmem [shape: s32[2,32,1], index: 2, kind: input, shape index: {}]   ;;  %s961_s3 = inlined_call_operand.vmem [shape: bf16[2,128], index: 3, kind: input, shape index: {}]   ;;  %s962_s4 = inlined_call_operand.vmem [shape: f32[1,128], index: 4, kind: input, shape index: {}]   ;;  %s963_s5 = inlined_call_operand.vmem [shape: f32[1,128], index: 5, kind: input, shape index: {}]   ;;  %s964_s6 = inlined_call_operand.hbm [shape: f32[2,32,128], index: 6, kind: output, shape index: {}]  }
   0x1   :  { %13 = vsyncpa [#allocation3 + $0x1], 0  ;;  %s803_s21 = smov 0   ;;  %s805_s22 = smov 0  }
   0x2   :  { %s807_s23 = smov 0   ;;  %s809_s24 = smov 0  }
   0x3   :  { %s811_s25 = smov 0   ;;  %s813_s26 = smov 0  }
   0x4   :  { %s815_s27 = smov 0   ;;  %s817_s28 = smov 0  }
   0x5 LB: > { %969 = sst [smem:[#allocation5_spill]] %s754_s26  ;;  %s559_s29 = sadd.s32 4294967295, %s762_s28   ;;  %s762_s28 = sphi %s817_s28, %s19_s28   ;;  %s758_s27 = sphi %s815_s27, %s978_s27   ;;  %s754_s26 = sphi %s813_s26, %s977_s26   ;;  %s750_s25 = sphi %s811_s25, %s976_s25   ;;  %s746_s24 = sphi %s809_s24, %s975_s24   ;;  %s742_s23 = sphi %s807_s23, %s981_s23   ;;  %s738_s22 = sphi %s805_s22, %s980_s22   ;;  %s734_s21 = sphi %s803_s21, %s979_s21  }
   0x6   : > { %970 = sst [smem:[#allocation6_spill]] %s758_s27  ;;  %s560_s30 = sadd.s32 4294967294, %s762_s28  }
   0x7   : > { %s28_s7 = sadd.s32 1, %s754_s26  ;;  %s31_s8 = sadd.s32 1, %s758_s27 }
   0x8   : > { %p29_p0 = scmp.ge.s32.totalorder %s28_s7, 2  ;;  %p195_p1 = scmp.ne.s32.totalorder %s742_s23, %s738_s22 }
   0x9   : > { %p196_p2 = scmp.eq.s32.totalorder %s559_s29, 3  ;;  %p201_p5 = scmp.ne.s32.totalorder %s738_s22, %s734_s21 }
   0xa   : > { %s983_s7 = smov (%p29_p0, %s28_s7), 0  ;;  %s985_s8 = smov (!%p29_p0, %s31_s8), %s758_s27 }
   0xb   : > { %971 = sst [smem:[#allocation7_spill]] %s983_s7  ;;  %s180_s9 = ssub.s32 %s754_s26, %s983_s7 }
   0xc   : > { %p852_p3 = por %p196_p2, %p195_p1  ;;  %p33_p4 = scmp.ge.s32.totalorder %s985_s8, 2 }
   0xd   : > { %p202_p6 = scmp.eq.s32.totalorder %s560_s30, 3  ;;  %p563_p7 = scmp.ge.s32.totalorder %s762_s28, 1 }
   0xe   : > { %s987_s8 = smov (%p33_p4, %s985_s8), 0  ;;  %p264_p9 = scmp.lt.s32.totalorder %s762_s28, 5 }
   0xf   : > { %973 = sst [smem:[#allocation8_spill]] %s987_s8  ;;  %p861_p8 = por %p202_p6, %p201_p5 }
  0x10   : > { %s181_s12 = ssub.s32 %s758_s27, %s987_s8  ;;  %s185_s13 = sadd.s32 1, %s742_s23 }
  0x11   : > { %s182_s14 = sor.u32 %s181_s12, %s180_s9  ;;  %p265_p10 = pnand %p563_p7, %p264_p9 }
  0x12   : > { %p183_p11 = scmp.eq.s32.totalorder %s182_s14, 0  ;;  %s872_s16 = sshll.u32 (!%p265_p10), %s750_s25, 1  ;;  %v764_v0 = vmov (!%p265_p10), 0   ;;  %v349_v13 = vld [vmem:[%s961_s3] sm:$0x1] (!%p265_p10)  ;;  %v367_v15 = vlaneseq (!%p265_p10) }
  0x13   : > { %268 = sbr.rel (%p265_p10) target bundleno = 359 (0x167), region = 44  ;;  %p313_p12 = scmp.lt.s32.totalorder (!%p265_p10), %s746_s24, 1  ;;  %663 = vset.pattern.permute.xlu0 (!%p265_p10), %v764_v0  ;;  %v350_v14 = vunpack.c.l.bf16 (!%p265_p10), %v349_v13  ;;  %v573_v51 = vld [vmem:[%s962_s4] ss:$0 sm:$0xff] (!%p265_p10) }
  0x14   : > { %s870_s15 = scalar_select %p183_p11, %s742_s23, %s185_s13  }
  0x15   : > { %p315_p13 = scmp.lt.s32.totalorder (!%p265_p10), %s872_s16, 3  ;;  %v354_v16 = vrot.slane (!%p265_p10), %v350_v14, 7  ;;  %v368_v17 = vshrl.u32 (!%p265_p10), %v367_v15, 7  ;;  %s309_s26 = sand.u32 (!%p265_p10), 1, %s738_s22   ;;  %v574_v53 = vld [vmem:[%s963_s5] ss:$0 sm:$0xff] (!%p265_p10) }
  0x16   : > { %s577_s27 = sshll.u32 (!%p265_p10), %s746_s24, 2 }
  0x17   : > { %v356_v18 = vsub.f32 (!%p265_p10), %v350_v14, %v354_v16  ;;  %v369_v19 = vsub.s32 (!%p265_p10), 1, %v368_v17  ;;  %v375_v20 = vsub.s32 (!%p265_p10), 0, %v368_v17  ;;  %s444_s9 = sadd.s32 (!%p265_p10), %s577_s27, %s872_s16 }
  0x19   : > { %v370_v21 = vrot.slane (!%p265_p10), %v356_v18, %v369_v19  ;;  %v376_v22 = vrot.slane (!%p265_p10), %v350_v14, %v375_v20 }
  0x1a   : > { %s314_s17 = scalar_select %p313_p12, %s746_s24, 1 }
  0x1b   : > { %s316_s18 = scalar_select %p315_p13, %s872_s16, 3 }
  0x1c   : > { %s566_s19 = sshll.u32 %s314_s17, 2  ;;  %s906_s16 = scalar_lea.sflag [#allocation3], %s309_s26 }
  0x1d   : > { %s318_s20 = sadd.s32 %s566_s19, %s316_s18  ;;  %s569_s29 = sshll.u32 %s316_s18, 2 }
  0x1e   : > { %s326_s12 = scalar_lea.vmem %s959_s1, %s569_s29  ;;  %s572_s13 = sshll.u32 %s318_s20, 3 }
  0x1f   : > { %s336_s8 = scalar_lea.vmem %s960_s2, %s572_s13  ;;  %v586_v1 = vld [vmem:[%s326_s12] sm:$0xff]   ;;  %s567_s7 = sshll.u32 %s318_s20, 2 }
  0x20   : > { %v347_v2 = vld [vmem:[%s336_s8] sm:$0xff]  ;;  %v348_v3 = vld [vmem:[%s336_s8 + $0x8] sm:$0xff]  ;;  %s320_s17 = scalar_lea.vmem %s958_s0, %s567_s7  ;;  %v587_v8 = vunpack.c.l.bf16 %v586_v1  ;;  %v588_v11 = vunpack.c.h.bf16 %v586_v1  ;;  %s564_s20 = sshll.u32 %s309_s26, 4 }
  0x21   : > { %v351_v4 = vcvt.s32.f32 %v347_v2  ;;  %v582_v5 = vld [vmem:[%s320_s17] sm:$0xff]   ;;  %v352_v7 = vcvt.s32.f32 %v348_v3  ;;  %s578_s12 = sshll.u32 %s444_s9, 7  ;;  %s311_s13 = scalar_lea.vmem [#allocation2], %s564_s20 }
  0x22   : > { %v583_v6 = vunpack.c.l.bf16 %v582_v5  ;;  %v584_v9 = vunpack.c.h.bf16 %v582_v5  ;;  %s447_s24 = sshll.u32 %s311_s13, 4  ;;  %s902_s17 = scalar_lea.hbm %s964_s6, %s578_s12  ;;  %s904_s24 = int_to_ptr.vmem [resolvable:$true] %s447_s24 }
  0x23   : > { %359 = vperm.xlu0 %663, %v351_v4   ;;  %s668_s18 = scalar_lea.vmem %s904_s24, 256  ;;  %s765_s19 = smov [#allocation2]  }
  0x24   : > { %v379_v10 = vadd.f32 %v587_v8, %v583_v6  ;;  %v380_v12 = vadd.f32 %v588_v11, %v584_v9  ;;  %p669_p0 = scmp.ne.s32.totalorder %s904_s24, %s668_s18  ;;  %s672_s27 = sshll.u32 %s765_s19, 4  ;;  %s673_s27 = int_to_ptr.vmem [resolvable:$false] %s672_s27 }
  0x25   : > { %s674_s7 = scalar_lea.vmem %s673_s27, 512  ;;  %p675_p4 = scmp.lt.s32.totalorder %s904_s24, %s673_s27 }
  0x26   : > { %p670_p1 = pnand %p669_p0, %p852_p3  ;;  %p676_p5 = scmp.lt.s32.totalorder %s674_s7, %s668_s18 }
  0x27   : > { %364 = vperm.xlu0 %663, %v352_v7  }
  0x28   : > { %p671_p2 = pneg %p670_p1  ;;  %p677_p6 = por %p676_p5, %p675_p4 }
  0x2a   : > { %p678_p7 = pnand %p677_p6, %p671_p2 }
  0xa2   : > { %v360_v23 = vpop.permute.xlu0 %359 }
  0xa3   : > { %v371_v24 = vmul.f32 %v370_v21, %v360_v23 }
  0xa5   : > { %v377_v25 = vadd.f32 %v376_v22, %v371_v24 }
  0xa6   : > { %v365_v26 = vpop.permute.xlu0 %364 }
  0xa7   : > { %v372_v27 = vmul.f32 %v370_v21, %v365_v26  ;;  %v381_v28 = vadd.f32 %v379_v10, %v377_v25 }
  0xa9   : > { %v378_v29 = vadd.f32 %v376_v22, %v372_v27  ;;  %383 = vadd.xlane.f32.xlu1 %v381_v28  ;;  %v387_v30 = vmul.f32 %v381_v28, %v381_v28 }
  0xab   : > { %389 = vadd.xlane.f32.xlu0 %v387_v30  ;;  %v382_v31 = vadd.f32 %v380_v12, %v378_v29 }
  0xad   : > { %385 = vadd.xlane.f32.xlu1 %v382_v31  ;;  %v388_v32 = vmul.f32 %v382_v31, %v382_v31 }
  0xb1   : > { %391 = vadd.xlane.f32.xlu1 %v388_v32 }
 0x136   : > { %v384_v33 = vpop.xlane.xlu1 %383 }
 0x137   : > { %v393_v34 = vmul.f32 0.0078125, %v384_v33 }
 0x138   : > { %v390_v35 = vpop.xlane.xlu0 %389 }
 0x139   : > { %v397_v36 = vmul.f32 %v393_v34, %v393_v34  ;;  %v395_v37 = vmul.f32 0.0078125, %v390_v35  ;;  %v407_v49 = vsub.f32 %v381_v28, %v393_v34 }
 0x13a   : > { %v386_v38 = vpop.xlane.xlu1 %385 }
 0x13b   : > { %v399_v39 = vsub.f32 %v395_v37, %v397_v36  ;;  %v394_v40 = vmul.f32 0.0078125, %v386_v38 }
 0x13d   : > { %v401_v41 = vmax.f32 %v399_v39, 0.0  ;;  %v398_v44 = vmul.f32 %v394_v40, %v394_v40  ;;  %v408_v55 = vsub.f32 %v382_v31, %v394_v40 }
 0x13e   : > { %v392_v42 = vpop.xlane.xlu1 %391 }
 0x13f   : > { %v403_v43 = vadd.f32 1e-12, %v401_v41  ;;  %v396_v45 = vmul.f32 0.0078125, %v392_v42 }
 0x141   : > { %664 = vrsqrt.f32 %v403_v43  ;;  %v400_v46 = vsub.f32 %v396_v45, %v398_v44 }
 0x143   : > { %v402_v47 = vmax.f32 %v400_v46, 0.0 }
 0x145   : > { %v404_v48 = vadd.f32 1e-12, %v402_v47 }
 0x147   : > { %666 = vrsqrt.f32 %v404_v48 }
 0x14b   : > { %v665_v50 = vpop.eup %664 }
 0x14c   : > { %v409_v52 = vmul.f32 %v665_v50, %v407_v49 }
 0x14e   : > { %v418_v54 = vmul.f32 %v573_v51, %v409_v52 }
 0x150   : > { %v427_v56 = vadd.f32 %v574_v53, %v418_v54 }
 0x151   : > { %v667_v57 = vpop.eup %666 }
 0x152   : > { %v410_v58 = vmul.f32 %v667_v57, %v408_v55  ;;  %429 = vst [vmem:[%s311_s13] sm:$0xff] %v427_v56 }
 0x154   : > { %v419_v59 = vmul.f32 %v573_v51, %v410_v58 }
 0x156   : > { %v428_v60 = vadd.f32 %v574_v53, %v419_v59 }
 0x158   : > { %430 = vst [vmem:[%s311_s13 + $0x8] sm:$0xff] %v428_v60 }
 0x159   : > { %681 = shalt.err (!%p678_p7)
}
 0x15a   : > { %s682_s26 = scalar_lea.hbm %s902_s17, 256  ;;  %s686_s29 = scalar_lea.hbm %s964_s6, 1024 }
 0x15b   : > { %p683_p9 = scmp.ne.s32.totalorder %s902_s17, %s682_s26  ;;  %p687_p12 = scmp.lt.u32.totalorder %s902_s17, %s964_s6 }
 0x15c   : > { %p688_p13 = scmp.lt.u32.totalorder %s686_s29, %s682_s26  ;;  %p690_p1 = scmp.lt.u32.totalorder %s682_s26, %s902_s17 }
 0x15d   : > { %p684_p10 = pnand %p683_p9, %p852_p3 }
 0x15e   : > { %p689_p0 = por %p688_p13, %p687_p12 }
 0x15f   : > { %p685_p11 = pneg %p684_p10 }
 0x160   : > { %p691_p2 = por %p690_p1, %p689_p0 }
 0x162   : > { %p692_p4 = pnand %p691_p2, %p685_p11 }
 0x164   : > { %695 = shalt.err (!%p692_p4)
}
 0x165   : > { %s766_s12 = smov 128   ;;  %s767_s13 = smov 8  }
 0x166   : > { %589 = dma.vmem_to_hbm [thread:$0]  (%p852_p3), %s904_s24, 256, %s902_s17, %s906_s16, %s766_s12, %s766_s12, %s767_s13  }
 0x167 PF: > { %p595_p5 = scmp.ge.s32.totalorder %s762_s28, 2  ;;  %s462_s25 = sand.u32 1, %s734_s21  }
 0x168   : > { %s463_s14 = scalar_lea.sflag [#allocation3], %s462_s25 }
 0x169   : > { %p592_p6 = pnand %p595_p5, %p861_p8 }
 0x16b   : > { %729 = dma.done.wait (!%p592_p6), %s463_s14, 256  }
 0x16c   : > { %731 = vsyncadd (!%p592_p6), %s463_s14, 4294967040  ;;  %s19_s28 = sadd.s32 1, %s762_s28   ;;  %s975_s24 = sld [smem:[#allocation5_spill]] }
 0x16d   : > { %p16_p7 = scmp.ge.s32.totalorder %s19_s28, 6   ;;  %s976_s25 = sld [smem:[#allocation6_spill]] }
 0x16e   : > { %s977_s26 = sld [smem:[#allocation7_spill]]  ;;  %s978_s27 = sld [smem:[#allocation8_spill]] }
 0x16f   : > { %s979_s21 = smov %s738_s22  ;;  %s980_s22 = smov %s742_s23 }
 0x170   : > { %s981_s23 = smov %s870_s15  ;;  %18 = sbr.rel (!%p16_p7) target bundleno = 5 (0x5), region = 85 }
 0x177   :  { %468 = vsyncpa [#allocation3], 1 }
 0x178   :  { %470 = vsyncpa [#allocation3 + $0x1], 1 }

</bundles_post_ra>
